<compile_context>
chip_gen: v7x
topology: tpu7x:2x2x1
jax: 0.10.0
libtpu: 0.0.40
codegen_flags: <defaults>
</compile_context>

<pallas_src>
import functools

import jax
import jax.numpy as jnp
from jax import lax
from jax.experimental import pallas as pl
from jax.experimental.pallas import tpu as pltpu


def _cdiv(a, b):
    return -(-a // b)


def _round_up(a, b):
    return _cdiv(a, b) * b


def _build_alpha(alpha, num_classes):
    """Replicates FocalLoss.__init__ alpha handling.

    Returns None for the all-ones fast path (alpha=None in the module)."""
    if alpha is None:
        return None
    if isinstance(alpha, (list, tuple)):
        assert len(alpha) == num_classes
        return jnp.asarray(alpha, jnp.float32)
    if isinstance(alpha, (int, float)):
        assert alpha < 1
        vec = jnp.full((num_classes,), 1.0 - float(alpha), jnp.float32)
        return vec.at[0].set(float(alpha))
    return jnp.asarray(alpha, jnp.float32)


def _focal_loss_kernel(nvalid_ref, preds_ref, labels_ref, *rest,
                       gamma, use_alpha):
    if use_alpha:
        alpha_ref, out_ref, acc_ref = rest
    else:
        alpha_ref = None
        out_ref, acc_ref = rest

    p = pl.program_id(0)          # core-group (parallel) axis
    t = pl.program_id(1)          # sequential lane-tile axis
    n_t = pl.num_programs(1)

    @pl.when(t == 0)
    def _init():
        acc_ref[...] = jnp.zeros_like(acc_ref)

    x = preds_ref[...].astype(jnp.float32)       # (C, TL): classes on sublanes
    labels = labels_ref[...]                     # (1, TL) int32
    c, tl = x.shape

    # Numerically stable log-softmax along the class (sublane) axis; only the
    # gathered (label) class is kept.
    m = jnp.max(x, axis=0, keepdims=True)                         # (1, TL)
    xs = x - m
    log_denom = jnp.log(jnp.sum(jnp.exp(xs), axis=0, keepdims=True))

    cls = lax.broadcasted_iota(jnp.int32, (c, tl), 0)
    one_hot = cls == labels                                       # (C, TL)
    logpt = jnp.sum(jnp.where(one_hot, xs, 0.0), axis=0,
                    keepdims=True) - log_denom                    # (1, TL)
    pt = jnp.exp(logpt)                                           # softmax @ label

    d = 1.0 - pt
    g = float(gamma)
    if g == 2.0:                                    # module default: 2 multiplies
        w = d * d
    elif g == float(int(g)) and 0 <= int(g) <= 8:   # small integer gammas: unroll
        gi = int(g)
        w = jnp.ones_like(d) if gi == 0 else d
        for _ in range(max(gi - 1, 0)):
            w = w * d
    else:                                           # general gamma: clamp base >= 0
        w = jnp.power(jnp.maximum(d, 0.0), jnp.float32(g))

    loss = w * (-logpt)                                           # (1, TL)
    if use_alpha:
        loss = alpha_ref[...] * loss                              # host-gathered alpha

    # Accumulate this tile into the VMEM vector accumulator.  Only tiles that
    # overlap the padded tail pay for the row-iota + compare + select.
    nvalid = nvalid_ref[0]
    tile_start = (p * n_t + t) * tl
    needs_mask = tile_start + tl > nvalid

    @pl.when(needs_mask)
    def _masked_acc():
        row = lax.broadcasted_iota(jnp.int32, (1, tl), 1) + tile_start
        acc_ref[...] += jnp.where(row < nvalid, loss, 0.0)

    @pl.when(jnp.logical_not(needs_mask))
    def _acc():
        acc_ref[...] += loss

    # Single finalize per core group: one cross-lane reduce, one output store.
    # (Relies on Pallas deferring output writeback until the block index
    # changes; the block index only depends on the parallel axis p.)
    @pl.when(t == n_t - 1)
    def _finalize():
        out_ref[...] = jnp.full((8, 128), jnp.sum(acc_ref[...]), jnp.float32)


def focal_loss(preds, labels, alpha=None, gamma=2, size_average=True, *,
               block_lanes=None, num_core_groups=1,
               preds_tile_budget_bytes=1 << 20):
    """preds: [B, N, C] or [B, C] (any float dtype); labels: [B, N] or [B]."""
    num_classes = preds.shape[-1]
    preds2 = preds.reshape(-1, num_classes)             # keep original dtype
    labels_flat = labels.reshape(-1).astype(jnp.int32)
    m = preds2.shape[0]

    alpha_vec = _build_alpha(alpha, num_classes)
    use_alpha = alpha_vec is not None

    # Lane tile TL (rows per grid step, riding the 128-lane axis), derived
    # from a VMEM byte budget for the preds tile so large-C cases don't blow
    # VMEM and tiny-C cases amortize the ~0.35 us per-grid-step overhead.
    itemsize = jnp.dtype(preds2.dtype).itemsize
    if block_lanes is None:
        tl = preds_tile_budget_bytes // max(num_classes * itemsize, 1)
    else:
        tl = int(block_lanes)
    tl = max(128, min(tl, 65536))
    tl = (tl // 128) * 128
    tl = min(tl, _round_up(max(m, 1), 128))

    tiles_total = _cdiv(max(m, 1), tl)
    ncores = num_core_groups if tiles_total >= num_core_groups else 1
    tiles_per_core = _cdiv(tiles_total, ncores)
    mpad = ncores * tiles_per_core * tl

    # Lane-dense repack: rows on the 128-lane axis, classes on sublanes.
    preds_t = jnp.pad(preds2, ((0, mpad - m), (0, 0))).T            # (C, M_pad)
    labels_row = jnp.pad(labels_flat, (0, mpad - m)).reshape(1, mpad)
    inputs = [preds_t, labels_row]

    def tile_map(p, t, nv):
        return (0, p * tiles_per_core + t)

    in_specs = [
        pl.BlockSpec((num_classes, tl), tile_map),   # preds tile (C on sublanes)
        pl.BlockSpec((1, tl), tile_map),             # labels row
    ]
    if use_alpha:
        # Host-side alpha gather: one f32 per row, streamed alongside labels.
        alpha_rows = jnp.pad(alpha_vec[labels_flat], (0, mpad - m))
        inputs.append(alpha_rows.reshape(1, mpad).astype(jnp.float32))
        in_specs.append(pl.BlockSpec((1, tl), tile_map))

    kernel = functools.partial(_focal_loss_kernel, gamma=float(gamma),
                               use_alpha=use_alpha)
    nvalid = jnp.asarray([m], jnp.int32)               # SMEM scalar prefetch

    partials = pl.pallas_call(
        kernel,
        out_shape=jax.ShapeDtypeStruct((ncores * 8, 128), jnp.float32),
        grid_spec=pltpu.PrefetchScalarGridSpec(
            num_scalar_prefetch=1,
            grid=(ncores, tiles_per_core),
            in_specs=in_specs,
            out_specs=pl.BlockSpec((8, 128), lambda p, t, nv: (p, 0)),
            scratch_shapes=[pltpu.VMEM((1, tl), jnp.float32)],   # vector accumulator
        ),
        compiler_params=pltpu.CompilerParams(
            dimension_semantics=("parallel", "arbitrary"),
            vmem_limit_bytes=32 * 1024 * 1024,   # safe on v5e/v6e/v7x
        ),
    )(nvalid, *inputs)

    per_core = partials.reshape(ncores, 8, 128)[:, 0, 0]
    total = jnp.sum(per_core)
    if size_average:
        return total / jnp.float32(max(m, 1))
    return total


def _reference_focal_loss(preds, labels, alpha_vec, gamma, size_average):
    num_classes = preds.shape[-1]
    p = preds.reshape(-1, num_classes).astype(jnp.float32)
    l = labels.reshape(-1).astype(jnp.int32)
    lsm = jax.nn.log_softmax(p, axis=1)
    log_pt = jnp.take_along_axis(lsm, l[:, None], axis=1)[:, 0]
    pt = jnp.exp(log_pt)
    a = jnp.ones((num_classes,), jnp.float32) if alpha_vec is None else alpha_vec
    a = a[l]
    loss = a * jnp.power(1.0 - pt, gamma) * (-log_pt)
    return jnp.mean(loss) if size_average else jnp.sum(loss)


if __name__ == "__main__":
    key = jax.random.PRNGKey(0)

    configs = [
        # module defaults: alpha=None -> ones, gamma=2, mean; detection shape [B,N,C]
        dict(shape=(2, 8, 2), alpha=None, gamma=2, size_average=True,
             dtype=jnp.float32, block_lanes=None, ncores=1),
        # multi-tile + 2-way core-group split + list alpha + sum reduction
        dict(shape=(2, 700, 5), alpha=[0.6, 0.1, 0.1, 0.1, 0.1], gamma=2,
             size_average=False, dtype=jnp.float32, block_lanes=256, ncores=2),
        # classification shape [B,C], scalar alpha, non-integer gamma, bf16 preds
        dict(shape=(300, 3), alpha=0.25, gamma=1.5, size_average=True,
             dtype=jnp.bfloat16, block_lanes=None, ncores=1),
    ]

    for i, cfg in enumerate(configs):
        key, kp, kl = jax.random.split(key, 3)
        shape = cfg["shape"]
        num_classes = shape[-1]
        preds = jax.random.normal(kp, shape, dtype=jnp.float32).astype(cfg["dtype"])
        labels = jax.random.randint(kl, shape[:-1], 0, num_classes, dtype=jnp.int32)

        out = focal_loss(preds, labels, alpha=cfg["alpha"], gamma=cfg["gamma"],
                         size_average=cfg["size_average"],
                         block_lanes=cfg["block_lanes"],
                         num_core_groups=cfg["ncores"])
        out = jax.block_until_ready(out)

        alpha_vec = _build_alpha(cfg["alpha"], num_classes)
        ref = _reference_focal_loss(preds, labels, alpha_vec,
                                    float(cfg["gamma"]), cfg["size_average"])
        assert jnp.allclose(out, ref, rtol=2e-4, atol=1e-5), (i, out, ref)

    print("KERNEL_OK")
</pallas_src>

<mosaic_0001>
module attributes {stable_mosaic.version = 11 : i64} {
  func.func @_focal_loss_kernel(%arg0: i32, %arg1: i32, %arg2: memref<1xi32, #tpu.memory_space<smem>>, %arg3: memref<2x128xf32, #tpu.memory_space<vmem>>, %arg4: memref<1x128xi32, #tpu.memory_space<vmem>>, %arg5: memref<8x128xf32, #tpu.memory_space<vmem>>, %arg6: memref<1x128xf32, #tpu.memory_space<vmem>>) attributes {dimension_semantics = [#tpu.dimension_semantics<parallel>, #tpu.dimension_semantics<arbitrary>], iteration_bounds = array<i64: 1, 1>, scalar_prefetch = 1 : i64, scratch_operands = 1 : i64, tpu.core_type = #tpu.core_type<tc>, window_params = [{transform_indices = @transform_0, window_bounds = array<i64: 2, 128>}, {transform_indices = @transform_1, window_bounds = array<i64: 1, 128>}, {transform_indices = @transform_2, window_bounds = array<i64: 8, 128>}]} {
    %c0_i32 = arith.constant 0 : i32
    %0 = arith.cmpi eq, %arg1, %c0_i32 : i32
    %1 = arith.extui %0 : i1 to i32
    %c0_i32_0 = arith.constant 0 : i32
    %2 = arith.cmpi ne, %1, %c0_i32_0 : i32
    scf.if %2 {
      %cst_15 = arith.constant 0.000000e+00 : f32
      %42 = vector.broadcast %cst_15 : f32 to vector<1x128xf32>
      %c0_16 = arith.constant 0 : index
      %c0_17 = arith.constant 0 : index
      %43 = vector.load %arg6[%c0_16, %c0_17] : memref<1x128xf32, #tpu.memory_space<vmem>>, vector<1x128xf32>
      tpu.vector_store %arg6[%c0_16, %c0_17], %42 {strides = array<i32>} : memref<1x128xf32, #tpu.memory_space<vmem>>, vector<1x128xf32>,
    } else {
    }
    %c0 = arith.constant 0 : index
    %c0_1 = arith.constant 0 : index
    %3 = vector.load %arg3[%c0, %c0_1] : memref<2x128xf32, #tpu.memory_space<vmem>>, vector<2x128xf32>
    %c0_2 = arith.constant 0 : index
    %c0_3 = arith.constant 0 : index
    %4 = vector.load %arg4[%c0_2, %c0_3] : memref<1x128xi32, #tpu.memory_space<vmem>>, vector<1x128xi32>
    %cst = arith.constant dense<0xFF800000> : vector<128xf32>
    %5 = vector.multi_reduction <maximumf>, %3, %cst [0] : vector<2x128xf32> to vector<128xf32>
    %6 = vector.shape_cast %5 : vector<128xf32> to vector<1x128xf32>
    %7 = vector.broadcast %6 : vector<1x128xf32> to vector<2x128xf32>
    %8 = arith.subf %3, %7 : vector<2x128xf32>
    %9 = math.exp %8 : vector<2x128xf32>
    %cst_4 = arith.constant dense<0.000000e+00> : vector<128xf32>
    %10 = vector.multi_reduction <add>, %9, %cst_4 [0] : vector<2x128xf32> to vector<128xf32>
    %11 = vector.shape_cast %10 : vector<128xf32> to vector<1x128xf32>
    %12 = math.log %11 : vector<1x128xf32>
    %13 = tpu.iota {dimensions = array<i32: 0>} : vector<2x128xi32>
    %14 = vector.broadcast %4 : vector<1x128xi32> to vector<2x128xi32>
    %15 = arith.cmpi eq, %13, %14 : vector<2x128xi32>
    %cst_5 = arith.constant 0.000000e+00 : f32
    %16 = vector.broadcast %cst_5 : f32 to vector<2x128xf32>
    %17 = arith.select %15, %8, %16 : vector<2x128xi1>, vector<2x128xf32>
    %cst_6 = arith.constant dense<0.000000e+00> : vector<128xf32>
    %18 = vector.multi_reduction <add>, %17, %cst_6 [0] : vector<2x128xf32> to vector<128xf32>
    %19 = vector.shape_cast %18 : vector<128xf32> to vector<1x128xf32>
    %20 = arith.subf %19, %12 : vector<1x128xf32>
    %21 = math.exp %20 : vector<1x128xf32>
    %cst_7 = arith.constant 1.000000e+00 : f32
    %22 = vector.broadcast %cst_7 : f32 to vector<1x128xf32>
    %23 = arith.subf %22, %21 : vector<1x128xf32>
    %24 = arith.mulf %23, %23 : vector<1x128xf32>
    %cst_8 = arith.constant 0.000000e+00 : f32
    %25 = vector.broadcast %cst_8 : f32 to vector<1x128xf32>
    %26 = arith.subf %25, %20 : vector<1x128xf32>
    %27 = arith.mulf %24, %26 : vector<1x128xf32>
    %c0_9 = arith.constant 0 : index
    %28 = memref.load %arg2[%c0_9] : memref<1xi32, #tpu.memory_space<smem>>
    %c1_i32 = arith.constant 1 : i32
    %29 = arith.muli %arg0, %c1_i32 : i32
    %30 = arith.addi %29, %arg1 : i32
    %c128_i32 = arith.constant 128 : i32
    %31 = arith.muli %30, %c128_i32 : i32
    %c128_i32_10 = arith.constant 128 : i32
    %32 = arith.addi %31, %c128_i32_10 : i32
    %33 = arith.cmpi sgt, %32, %28 : i32
    %34 = arith.extui %33 : i1 to i32
    %c0_i32_11 = arith.constant 0 : i32
    %35 = arith.cmpi ne, %34, %c0_i32_11 : i32
    scf.if %35 {
      %42 = tpu.iota {dimensions = array<i32: 1>} : vector<1x128xi32>
      %43 = vector.broadcast %31 : i32 to vector<1x128xi32>
      %44 = arith.addi %42, %43 : vector<1x128xi32>
      %c0_15 = arith.constant 0 : index
      %c0_16 = arith.constant 0 : index
      %45 = vector.load %arg6[%c0_15, %c0_16] : memref<1x128xf32, #tpu.memory_space<vmem>>, vector<1x128xf32>
      %46 = vector.broadcast %28 : i32 to vector<1x128xi32>
      %47 = arith.cmpi slt, %44, %46 : vector<1x128xi32>
      %cst_17 = arith.constant 0.000000e+00 : f32
      %48 = vector.broadcast %cst_17 : f32 to vector<1x128xf32>
      %49 = arith.select %47, %27, %48 : vector<1x128xi1>, vector<1x128xf32>
      %50 = arith.addf %45, %49 : vector<1x128xf32>
      %c0_18 = arith.constant 0 : index
      %c0_19 = arith.constant 0 : index
      %51 = vector.load %arg6[%c0_18, %c0_19] : memref<1x128xf32, #tpu.memory_space<vmem>>, vector<1x128xf32>
      tpu.vector_store %arg6[%c0_18, %c0_19], %50 {strides = array<i32>} : memref<1x128xf32, #tpu.memory_space<vmem>>, vector<1x128xf32>,
    } else {
    }
    %true = arith.constant true
    %36 = arith.xori %33, %true : i1
    %37 = arith.extui %36 : i1 to i32
    %c0_i32_12 = arith.constant 0 : i32
    %38 = arith.cmpi ne, %37, %c0_i32_12 : i32
    scf.if %38 {
      %c0_15 = arith.constant 0 : index
      %c0_16 = arith.constant 0 : index
      %42 = vector.load %arg6[%c0_15, %c0_16] : memref<1x128xf32, #tpu.memory_space<vmem>>, vector<1x128xf32>
      %43 = arith.addf %42, %27 : vector<1x128xf32>
      %c0_17 = arith.constant 0 : index
      %c0_18 = arith.constant 0 : index
      %44 = vector.load %arg6[%c0_17, %c0_18] : memref<1x128xf32, #tpu.memory_space<vmem>>, vector<1x128xf32>
      tpu.vector_store %arg6[%c0_17, %c0_18], %43 {strides = array<i32>} : memref<1x128xf32, #tpu.memory_space<vmem>>, vector<1x128xf32>,
    } else {
    }
    %c0_i32_13 = arith.constant 0 : i32
    %39 = arith.cmpi eq, %arg1, %c0_i32_13 : i32
    %40 = arith.extui %39 : i1 to i32
    %c0_i32_14 = arith.constant 0 : i32
    %41 = arith.cmpi ne, %40, %c0_i32_14 : i32
    scf.if %41 {
      %c0_15 = arith.constant 0 : index
      %c0_16 = arith.constant 0 : index
      %42 = vector.load %arg6[%c0_15, %c0_16] : memref<1x128xf32, #tpu.memory_space<vmem>>, vector<1x128xf32>
      %43 = vector.shape_cast %42 : vector<1x128xf32> to vector<1x1x128xf32>
      %cst_17 = arith.constant dense<0.000000e+00> : vector<1xf32>
      %44 = vector.multi_reduction <add>, %43, %cst_17 [1, 2] : vector<1x1x128xf32> to vector<1xf32>
      %45 = vector.shape_cast %44 : vector<1xf32> to vector<1x1x1xf32>
      %46 = vector.extract %45[0, 0, 0] : f32 from vector<1x1x1xf32>
      %47 = vector.broadcast %46 : f32 to vector<8x128xf32>
      %c0_18 = arith.constant 0 : index
      %c0_19 = arith.constant 0 : index
      %48 = vector.load %arg5[%c0_18, %c0_19] : memref<8x128xf32, #tpu.memory_space<vmem>>, vector<8x128xf32>
      tpu.vector_store %arg5[%c0_18, %c0_19], %47 {strides = array<i32>} : memref<8x128xf32, #tpu.memory_space<vmem>>, vector<8x128xf32>,
    } else {
    }
    return
  }
  func.func @transform_0(%arg0: i32, %arg1: i32, %arg2: memref<1xi32, #tpu.memory_space<smem>>) -> (i32, i32) {
    %c1_i32 = arith.constant 1 : i32
    %0 = arith.muli %arg0, %c1_i32 : i32
    %1 = arith.addi %0, %arg1 : i32
    %c0_i32 = arith.constant 0 : i32
    %c0_i32_0 = arith.constant 0 : i32
    return %c0_i32, %1 : i32, i32
  }
  func.func @transform_1(%arg0: i32, %arg1: i32, %arg2: memref<1xi32, #tpu.memory_space<smem>>) -> (i32, i32) {
    %c1_i32 = arith.constant 1 : i32
    %0 = arith.muli %arg0, %c1_i32 : i32
    %1 = arith.addi %0, %arg1 : i32
    %c0_i32 = arith.constant 0 : i32
    %c0_i32_0 = arith.constant 0 : i32
    return %c0_i32, %1 : i32, i32
  }
  func.func @transform_2(%arg0: i32, %arg1: i32, %arg2: memref<1xi32, #tpu.memory_space<smem>>) -> (i32, i32) {
    %c0_i32 = arith.constant 0 : i32
    %c0_i32_0 = arith.constant 0 : i32
    return %arg0, %c0_i32 : i32, i32
  }
}

</mosaic_0001>

<bundles_post_ra>
// kernel: tpu_custom_call.1
= control target key start
LH: loop header
LB: loop body
LE: loop exit
PB: predicated region body
PF: predicated region fallthrough
CT: control target
= control target key end

     0   :  { %9 = vsyncpa [#allocation6], 0  ;;  %vm52_vm0 = vcmask 1041408   ;;  %v198_v1 = vmov 0.0   ;;  %v72_v10 = vlaneseq  ;;  %s250_s0 = inlined_call_operand.<no memory space> [shape: s32[1], index: 0, kind: input, shape index: {}]   ;;  %s251_s1 = inlined_call_operand.vmem [shape: f32[2,128], index: 1, kind: input, shape index: {}]   ;;  %s252_s2 = inlined_call_operand.vmem [shape: s32[1,128], index: 2, kind: input, shape index: {}]   ;;  %s253_s3 = inlined_call_operand.hbm [shape: f32[8,128], index: 3, kind: output, shape index: {}]  }
   0x1   :  { %v50_v0 = vld [vmem:[%s251_s1] sm:$0x3]  ;;  %49 = vst [vmem:[#allocation2] sm:$0x1] %v198_v1  ;;  %p161_p0 = scmp.ge.s32.totalorder %s250_s0, 128 }
   0x2   :  { %v53_v2 = vsel %vm52_vm0, %v50_v0, -inf  ;;  %v73_v12 = vshrl.u32 %v72_v10, 7  ;;  %v159_v13 = vld [vmem:[%s252_s2] ss:$0 sm:$0xff]  ;;  %v103_v39 = vand.u32 (!%p161_p0), 127, %v72_v10  ;;  %v107_v40 = vstv (!%p161_p0), %s250_s0 }
   0x3   :  { %v54_v3 = vrot.slane %v53_v2, 4 }
   0x4   :  { %vm78_vm1 = vcmp.eq.s32.totalorder %v73_v12, %v159_v13  ;;  %vm108_vm2 = vcmp.lt.s32.totalorder (!%p161_p0), %v103_v39, %v107_v40 }
   0x5   :  { %v55_v4 = vmax.f32 %v53_v2, %v54_v3 }
   0x7   :  { %v56_v5 = vrot.slane %v55_v4, 2 }
   0x8   :  { %v106_v41 = vld [vmem:[#allocation2] sm:$0x1] (!%p161_p0) }
   0x9   :  { %v57_v6 = vmax.f32 %v55_v4, %v56_v5 }
   0xb   :  { %v58_v7 = vrot.slane %v57_v6, 1 }
   0xd   :  { %v59_v8 = vmax.f32 %v57_v6, %v58_v7 }
   0xf   :  { %v60_v9 = vsub.f32 %v50_v0, %v59_v8 }
  0x11   :  { %v61_v11 = vmul.f32 1.442695, %v60_v9  ;;  %v79_v14 = vsel %vm78_vm1, %v60_v9, 0.0 }
  0x12   :  { %v80_v16 = vsel %vm52_vm0, %v79_v14, 0.0 }
  0x13   :  { %168 = vpow2.f32 %v61_v11  ;;  %v81_v19 = vrot.slane %v80_v16, 4 }
  0x15   :  { %v82_v22 = vadd.f32 %v81_v19, %v80_v16 }
  0x17   :  { %v83_v25 = vrot.slane %v82_v22, 2 }
  0x19   :  { %v84_v27 = vadd.f32 %v83_v25, %v82_v22 }
  0x1b   :  { %v85_v28 = vrot.slane %v84_v27, 1 }
  0x1d   :  { %v169_v15 = vpop.eup %168  ;;  %v86_v29 = vadd.f32 %v85_v28, %v84_v27 }
  0x1e   :  { %v63_v17 = vsel %vm52_vm0, %v169_v15, 0.0 }
  0x1f   :  { %v64_v18 = vrot.slane %v63_v17, 4 }
  0x21   :  { %v65_v20 = vadd.f32 %v64_v18, %v63_v17 }
  0x23   :  { %v66_v21 = vrot.slane %v65_v20, 2 }
  0x25   :  { %v67_v23 = vadd.f32 %v66_v21, %v65_v20 }
  0x27   :  { %v68_v24 = vrot.slane %v67_v23, 1 }
  0x29   :  { %v69_v26 = vadd.f32 %v68_v24, %v67_v23 }
  0x2b   :  { %170 = vlog2.f32 %v69_v26 }
  0x35   :  { %v171_v30 = vpop.eup %170 }
  0x36   :  { %v71_v31 = vmul.f32 0.6931472, %v171_v30 }
  0x38   :  { %v87_v32 = vsub.f32 %v86_v29, %v71_v31 }
  0x3a   :  { %v88_v33 = vmul.f32 1.442695, %v87_v32  ;;  %v92_v36 = vsub.f32 0.0, %v87_v32 }
  0x3c   :  { %172 = vpow2.f32 %v88_v33 }
  0x45   :  { %101 = sbr.rel (%p161_p0) target bundleno = 81 (0x51), region = 17 }
  0x46   :  { %v173_v34 = vpop.eup %172 }
  0x47   :  { %v90_v35 = vsub.f32 1.0, %v173_v34 }
  0x49   :  { %v91_v37 = vmul.f32 %v90_v35, %v90_v35 }
  0x4b   :  { %v93_v38 = vmul.f32 %v92_v36, %v91_v37 }
  0x4d   :  { %v109_v42 = vsel %vm108_vm2, %v93_v38, 0.0 }
  0x4e   :  { %v110_v43 = vadd.f32 %v109_v42, %v106_v41 }
  0x50   :  { %111 = vst [vmem:[#allocation2] sm:$0x1] %v110_v43 }
  0x51 PF:  { %p163_p1 = scmp.lt.s32.totalorder %s250_s0, 128 }
  0x53   :  { %115 = sbr.rel (%p163_p1) target bundleno = 91 (0x5b), region = 21 }
  0x57   :  { %v116_v44 = vld [vmem:[#allocation2] sm:$0x1] (!%p163_p1) }
  0x58   :  { %v117_v45 = vadd.f32 (!%p163_p1), %v116_v44, %v93_v38 }
  0x5a   :  { %118 = vst [vmem:[#allocation2] sm:$0x1] %v117_v45 }
  0x5b PF:  { %vm123_vm3 = vcmask 1040384   ;;  %s199_s20 = smov [#allocation5]  }
  0x5c   :  { %s142_s21 = sshll.u32 %s199_s20, 4  ;;  %s143_s21 = int_to_ptr.vmem [resolvable:$true] %s142_s21 }
  0x5d   :  { %s174_s22 = scalar_lea.vmem %s143_s21, 128  ;;  %p179_p3 = scmp.lt.s32.totalorder %s143_s21, %s143_s21 }
  0x5e   :  { %p175_p2 = scmp.ne.s32.totalorder %s143_s21, %s174_s22  ;;  %p180_p4 = scmp.lt.s32.totalorder %s174_s22, %s174_s22 }
  0x60   :  { %p181_p5 = por %p180_p4, %p179_p3 }
  0x61   :  { %v122_v46 = vld [vmem:[#allocation2] sm:$0x1] }
  0x62   :  { %v124_v47 = vsel %vm123_vm3, %v122_v46, 0.0  ;;  %p182_p6 = pnand %p181_p5, %p175_p2 }
  0x63   :  { %125 = vadd.xlane.f32.xlu0 %v124_v47 }
  0xf0   :  { %v126_v48 = vpop.xlane.xlu0 %125 }
  0xf1   :  { %v127_v49 = vrot.slane %v126_v48, 4 }
  0xf3   :  { %v128_v50 = vadd.f32 %v127_v49, %v126_v48 }
  0xf5   :  { %v129_v51 = vrot.slane %v128_v50, 2 }
  0xf7   :  { %v130_v52 = vadd.f32 %v129_v51, %v128_v50 }
  0xf9   :  { %v131_v53 = vrot.slane %v130_v52, 1 }
  0xfb   :  { %v132_v54 = vadd.f32 %v131_v53, %v130_v52 }
  0xfd   :  { %164 = vpush %v132_v54 }
 0x12e   :  { %s165_s0 = spop %164 }
 0x12f   :  { %v134_v55 = vstv %s165_s0 }
 0x130   :  { %135 = vst [vmem:[#allocation5] sm:$0xff] %v134_v55 }
 0x131   :  { %185 = shalt.err (!%p182_p6)
}
 0x132   :  { %s186_s25 = scalar_lea.hbm %s253_s3, 128 }
 0x133   :  { %p187_p7 = scmp.ne.s32.totalorder %s253_s3, %s186_s25  ;;  %p190_p8 = scmp.lt.u32.totalorder %s186_s25, %s253_s3 }
 0x135   :  { %p192_p9 = pnand %p190_p8, %p187_p7 }
 0x137   :  { %195 = shalt.err (!%p192_p9)
}
 0x138   :  { %145 = dma.vmem_to_hbm [thread:$0]  %s143_s21, 128, %s253_s3, [#allocation6]  }
 0x139   :  { %196 = dma.done.wait [#allocation6], 128  }
 0x13a   :  { %197 = vsyncadd [#allocation6], 4294967168 }
 0x13b   :  { %149 = vsyncpa [#allocation6], 1 }

</bundles_post_ra>
